<compile_context>
chip_gen: v6e
topology: v6e:2x2x1
jax: 0.10.0
libtpu: 0.0.40
codegen_flags: <defaults>
</compile_context>

<pallas_src>
import functools

import jax
import jax.numpy as jnp
from jax.experimental import pallas as pl
from jax.experimental.pallas import tpu as pltpu


def _round_up(a, b):
    return -(-a // b) * b


def _tpu_kind():
    try:
        return jax.devices()[0].device_kind.lower()
    except Exception:
        return ""


def _arch_config():
    """Generation-aware VMEM budget, row-tile cap and operand-dtype selection."""
    kind = _tpu_kind()
    is_v7 = ("v7" in kind) or ("tpu7" in kind)
    big_vmem = (not is_v7) and any(t in kind for t in ("v4", "v5", "v6"))  # 128 MiB
    int8_mxu = (not is_v7) and any(t in kind for t in ("v5", "v6"))        # int MXU
    if big_vmem:
        # v5e/v6e: 128 MiB VMEM -> spend most of it so W is re-streamed rarely.
        return dict(int8_mxu=int8_mxu, budget=88 << 20, limit_cap=100 << 20,
                    max_rows=512)
    # v7x (64 MiB / TC) or unknown chip: stay conservative.
    return dict(int8_mxu=int8_mxu, budget=40 << 20, limit_cap=48 << 20,
                max_rows=256)


def quantize_linear_weight(linear_weight, compute_dtype, operand_dtype):
    """weight_quant (per-tensor 1.58-bit), factored into ternary codes + scale.

    Returns (wq_t, w_inv): wq_t is (N, N_out) ternary codes in `operand_dtype`
    (already transposed for the MXU), w_inv == 1/wscale == clamp(mean|W|, 1e-5).
    Hoist/cache this for static (inference) weights to avoid redoing the full-W
    passes on every forward call.
    """
    # PyTorch casts the linear weight to the activation dtype before quantizing.
    wf = linear_weight.astype(compute_dtype).astype(jnp.float32)
    w_inv = jnp.maximum(jnp.mean(jnp.abs(wf)), 1e-5)
    wscale = 1.0 / w_inv
    codes = jnp.clip(jnp.round(wf * wscale), -1.0, 1.0)
    wq_t = codes.astype(operand_dtype).T                      # (N, N_out)
    return wq_t, w_inv.astype(jnp.float32)


def _ln_linear_kernel(x_ref, nw_ref, winv_ref, w_ref, *rest, eps, has_bias,
                      acc_dtype):
    """One (tm, tn) output tile.

    x_ref   : (tm, N)  input rows
    nw_ref  : (1, N)   layernorm weight (fp32, pre-cast in the wrapper)
    winv_ref: (1, 1)   1/wscale of the per-tensor weight quant (fp32)
    w_ref   : (N, tn)  ternary weight codes (int8 or bf16), already transposed
    b_ref   : (1, tn)  optional fp32 bias tile
    o_ref   : (tm, tn) output tile
    yq_ref  : (tm, N)  scratch with integer activation codes (operand dtype)
    rs_ref  : (tm, 1)  scratch with the fused per-row dequant scale (fp32)
    """
    if has_bias:
        b_ref, o_ref, yq_ref, rs_ref = rest
    else:
        b_ref = None
        o_ref, yq_ref, rs_ref = rest

    j = pl.program_id(1)

    @pl.when(j == 0)
    def _():
        # LayerNorm in fp32 + per-token activation_quant, computed once per row
        # block and reused for every output-column tile.
        x = x_ref[...].astype(jnp.float32)
        mean = jnp.mean(x, axis=-1, keepdims=True)
        xc = x - mean
        var = jnp.mean(xc * xc, axis=-1, keepdims=True)          # biased variance
        y = xc * jax.lax.rsqrt(var + eps) * nw_ref[...]
        amax = jnp.maximum(jnp.max(jnp.abs(y), axis=-1, keepdims=True), 1e-5)
        # Integer activation codes in [-128, 127]; exact in int8 and in bf16.
        q = jnp.clip(jnp.round(y * (127.0 / amax)), -128.0, 127.0)
        yq_ref[...] = q.astype(yq_ref.dtype)
        # Fused dequant scale (per row): (amax / 127) * (1 / wscale).
        rs_ref[...] = amax * (winv_ref[...] * (1.0 / 127.0))

    # MXU on exact codes (int8 on v5e/v6e, bf16 elsewhere); dequant + bias in the
    # tiny (tm, tn) epilogue instead of full-tensor divides.
    acc = jnp.dot(yq_ref[...], w_ref[...], preferred_element_type=acc_dtype)
    out = acc.astype(jnp.float32) * rs_ref[...]
    if has_bias:
        out = out + b_ref[...]
    o_ref[...] = out.astype(o_ref.dtype)


def layer_norm_linear_pallas(x, norm_weight, linear_weight, linear_bias=None,
                             eps=1e-5, *, quantized_weight=None,
                             operand_dtype=None, max_rows=None,
                             vmem_budget_bytes=None):
    """Fused LayerNorm -> activation_quant -> (1.58-bit quantized) Linear."""
    cfg = _arch_config()
    if max_rows is None:
        max_rows = cfg["max_rows"]
    if vmem_budget_bytes is None:
        vmem_budget_bytes = cfg["budget"]

    x_shape_og = x.shape
    N = x_shape_og[-1]
    x2d = x.reshape(-1, N)
    M = x2d.shape[0]
    N_out = linear_weight.shape[0]
    compute_dtype = x.dtype

    # Operand dtype for the matmul codes: int8 feeds v5e/v6e's integer MXU and
    # shrinks W HBM/VMEM 2-4x; v7x has no integer MXU -> bf16 (codes are exact).
    if operand_dtype is None:
        aligned = (N % 128 == 0) and (N_out % 128 == 0)
        operand_dtype = jnp.int8 if (cfg["int8_mxu"] and aligned) else jnp.bfloat16
    is_int = jnp.issubdtype(jnp.dtype(operand_dtype), jnp.integer)
    acc_dtype = jnp.int32 if is_int else jnp.float32

    # LayerNorm weight: pre-cast to fp32 here (hoisted out of the kernel body).
    if norm_weight is None:
        nw2d = jnp.ones((1, N), jnp.float32)
    else:
        nw2d = norm_weight.astype(jnp.float32).reshape(1, N)

    # weight_quant: one global reduction + ternary codes; cacheable for inference.
    if quantized_weight is None:
        wq_t, w_inv = quantize_linear_weight(linear_weight, compute_dtype,
                                             operand_dtype)
    else:
        wq_t, w_inv = quantized_weight
        wq_t = wq_t.astype(operand_dtype)
    winv2d = jnp.reshape(w_inv, (1, 1)).astype(jnp.float32)

    has_bias = linear_bias is not None

    xbytes = jnp.dtype(x2d.dtype).itemsize
    wbytes = jnp.dtype(operand_dtype).itemsize
    obytes = jnp.dtype(compute_dtype).itemsize

    budget = int(vmem_budget_bytes)
    w_budget = budget // 2

    # ---- output-column tiling ----------------------------------------------
    # W-resident when the whole (N, N_out) ternary W^T fits (fetched only once);
    # otherwise the largest 128-multiple divisor of N_out that fits the budget
    # (avoids padding W, which would be a full extra HBM copy).
    if 2 * N * N_out * wbytes <= w_budget:
        tn = N_out
    else:
        cap_cols = max(128, (w_budget // (2 * N * wbytes)) // 128 * 128)
        tn = 0
        c = min(cap_cols, (N_out // 128) * 128)
        while c >= 128:
            if N_out % c == 0:
                tn = c
                break
            c -= 128
        if tn == 0:
            tn = min(cap_cols, 512)      # fallback: requires padding N_out
    n_out_pad = _round_up(N_out, tn)

    # ---- row tiling ----------------------------------------------------------
    row_align = 32 if is_int else 8      # int8 sublane tile is 32
    w_tile_bytes = 2 * N * tn * wbytes
    per_row_bytes = 2 * N * xbytes + N * wbytes + 2 * tn * obytes + 512
    avail = max(budget - w_tile_bytes - 2 * N * 4, 1 << 20)
    tm_cap = max(row_align,
                 min(max_rows, (avail // per_row_bytes) // row_align * row_align))
    # Balance tm across row tiles to minimize zero-row padding
    # (e.g. M=300, cap=256 -> tm=152 instead of padding 300 -> 512).
    n_row_tiles = -(-M // tm_cap)
    tm = _round_up(-(-M // n_row_tiles), row_align)
    m_pad = _round_up(M, tm)

    if m_pad != M:
        x2d = jnp.pad(x2d, ((0, m_pad - M), (0, 0)))
    if n_out_pad != N_out:
        wq_t = jnp.pad(wq_t, ((0, 0), (0, n_out_pad - N_out)))

    grid = (m_pad // tm, n_out_pad // tn)

    in_specs = [
        pl.BlockSpec((tm, N), lambda i, j: (i, 0)),     # x rows
        pl.BlockSpec((1, N), lambda i, j: (0, 0)),      # layernorm weight
        pl.BlockSpec((1, 1), lambda i, j: (0, 0)),      # 1/wscale
        pl.BlockSpec((N, tn), lambda i, j: (0, j)),     # ternary W^T columns
    ]
    operands = [x2d, nw2d, winv2d, wq_t]
    if has_bias:
        b2d = linear_bias.astype(jnp.float32).reshape(1, N_out)
        if n_out_pad != N_out:
            b2d = jnp.pad(b2d, ((0, 0), (0, n_out_pad - N_out)))
        in_specs.append(pl.BlockSpec((1, tn), lambda i, j: (0, j)))  # fused bias
        operands.append(b2d)

    vmem_estimate = (2 * tm * N * xbytes          # x tiles (double-buffered)
                     + 2 * N * 4                  # norm weight
                     + w_tile_bytes               # W tile(s)
                     + 2 * tm * tn * obytes       # output tile
                     + tm * N * wbytes            # activation-code scratch
                     + tm * 128 * 4               # row-scale scratch (padded)
                     + (2 * tn * 4 if has_bias else 0))
    vmem_limit = int(max(min(cfg["limit_cap"], vmem_estimate + (8 << 20)),
                         16 << 20))

    out = pl.pallas_call(
        functools.partial(_ln_linear_kernel, eps=float(eps), has_bias=has_bias,
                          acc_dtype=acc_dtype),
        out_shape=jax.ShapeDtypeStruct((m_pad, n_out_pad), compute_dtype),
        grid_spec=pltpu.PrefetchScalarGridSpec(
            num_scalar_prefetch=0,
            grid=grid,
            in_specs=in_specs,
            out_specs=pl.BlockSpec((tm, tn), lambda i, j: (i, j)),
            scratch_shapes=[pltpu.VMEM((tm, N), operand_dtype),   # activation codes
                            pltpu.VMEM((tm, 1), jnp.float32)],    # per-row scale
        ),
        compiler_params=pltpu.CompilerParams(
            # Row axis is independent -> megacore-shardable.  Column axis revisits
            # the per-row-block scratch -> must stay serial.
            dimension_semantics=("parallel", "arbitrary"),
            vmem_limit_bytes=vmem_limit,
        ),
    )(*operands)

    if m_pad != M or n_out_pad != N_out:
        out = out[:M, :N_out]
    return out.reshape(*x_shape_og[:-1], N_out)


def layer_norm_linear_ref(x, norm_weight, linear_weight, linear_bias=None,
                          eps=1e-5):
    """Pure-JAX reference mirroring the PyTorch forward."""
    shape_og = x.shape
    N = shape_og[-1]
    xf = x.reshape(-1, N).astype(jnp.float32)
    mean = jnp.mean(xf, axis=-1, keepdims=True)
    var = jnp.mean((xf - mean) ** 2, axis=-1, keepdims=True)
    y = (xf - mean) * jax.lax.rsqrt(var + eps)
    if norm_weight is not None:
        y = y * norm_weight.astype(jnp.float32)
    scale = 127.0 / jnp.maximum(jnp.max(jnp.abs(y), axis=-1, keepdims=True), 1e-5)
    yq = jnp.clip(jnp.round(y * scale), -128.0, 127.0) / scale
    wf = linear_weight.astype(x.dtype).astype(jnp.float32)
    wscale = 1.0 / jnp.maximum(jnp.mean(jnp.abs(wf)), 1e-5)
    wq = jnp.clip(jnp.round(wf * wscale), -1.0, 1.0) / wscale
    out = yq @ wq.T
    if linear_bias is not None:
        out = out + linear_bias.astype(jnp.float32)
    out = out.astype(x.dtype)
    return out.reshape(*shape_og[:-1], linear_weight.shape[0])


class LayerNormLinear:
    """Minimal JAX mirror of the PyTorch LayerNormLinear module (forward only)."""

    def __init__(self, hidden_size, elementwise_affine: bool = True,
                 eps: float = 1e-5, dtype=jnp.float32):
        self.hidden_size = hidden_size
        self.elementwise_affine = elementwise_affine
        self.eps = eps
        # nn.Parameter(torch.ones(hidden_size)) -> deterministic ones init.
        self.weight = (jnp.ones((hidden_size,), dtype=dtype)
                       if elementwise_affine else None)
        self.bias = None  # the module always registers the norm bias as None

    def __call__(self, x, weight, bias, residual=None, prenorm=False,
                 residual_in_fp32=False):
        # TODO(synk): residual / prenorm / residual_in_fp32 paths (and backward)
        # are not implemented; the fused kernel covers the default forward.
        assert residual is None and not prenorm
        return layer_norm_linear_pallas(x, self.weight, weight, bias, eps=self.eps)


def _assert_close(out, ref, want_dtype, want_shape):
    assert out.shape == tuple(want_shape), (out.shape, want_shape)
    assert out.dtype == want_dtype, (out.dtype, want_dtype)
    diff = jnp.abs(out.astype(jnp.float32) - ref.astype(jnp.float32))
    max_d = float(jnp.max(diff))
    mean_d = float(jnp.mean(diff))
    # Fake-quant output is a step function of its inputs: a last-ulp difference in
    # the fp32 LayerNorm reductions (Mosaic vs XLA ordering) can flip a single
    # 8-bit activation code, shifting affected outputs by one quant step (~2e-2).
    # Require the bulk of the output to match tightly and bound the worst case.
    assert max_d < 7e-2, f"max abs diff too large: {max_d}"
    assert mean_d < 2e-3, f"mean abs diff too large: {mean_d}"


if __name__ == "__main__":
    key = jax.random.PRNGKey(0)
    k1, k2, k3, k4, k5, k6 = jax.random.split(key, 6)

    # --- Test 1: module-style small shapes (batch=2, seq=8, hidden=32, out=64) ---
    batch, seq, hidden, out_features = 2, 8, 32, 64
    x = jax.random.normal(k1, (batch, seq, hidden), dtype=jnp.float32)
    linear_weight = jax.random.normal(k2, (out_features, hidden), dtype=jnp.float32)

    module = LayerNormLinear(hidden_size=hidden, elementwise_affine=True, eps=1e-5)
    out1 = jax.block_until_ready(module(x, linear_weight, None))
    ref1 = layer_norm_linear_ref(x, module.weight, linear_weight, None,
                                 eps=module.eps)
    _assert_close(out1, ref1, x.dtype, (batch, seq, out_features))

    # --- Test 2: 128-aligned dims + fused bias + uneven row count (M=200) --------
    # Exercises the int8-MXU path on v5e/v6e (bf16 elsewhere) and the row balancer.
    M2, N2, O2 = 200, 256, 512
    x2 = jax.random.normal(k3, (M2, N2), dtype=jnp.float32)
    nw2 = 1.0 + 0.1 * jax.random.normal(k4, (N2,), dtype=jnp.float32)
    lw2 = jax.random.normal(k5, (O2, N2), dtype=jnp.float32)
    lb2 = jax.random.normal(k6, (O2,), dtype=jnp.float32)
    out2 = jax.block_until_ready(
        layer_norm_linear_pallas(x2, nw2, lw2, lb2, eps=1e-6))
    ref2 = layer_norm_linear_ref(x2, nw2, lw2, lb2, eps=1e-6)
    _assert_close(out2, ref2, x2.dtype, (M2, O2))

    print("KERNEL_OK")
</pallas_src>

<mosaic_0001>
module attributes {stable_mosaic.version = 11 : i64} {
  func.func @_ln_linear_kernel(%arg0: i32, %arg1: i32, %arg2: memref<16x32xf32, #tpu.memory_space<vmem>>, %arg3: memref<1x32xf32, #tpu.memory_space<vmem>>, %arg4: memref<1x1xf32, #tpu.memory_space<vmem>>, %arg5: memref<32x64xbf16, #tpu.memory_space<vmem>>, %arg6: memref<16x64xf32, #tpu.memory_space<vmem>>, %arg7: memref<16x32xbf16, #tpu.memory_space<vmem>>, %arg8: memref<16x1xf32, #tpu.memory_space<vmem>>) attributes {dimension_semantics = [#tpu.dimension_semantics<parallel>, #tpu.dimension_semantics<arbitrary>], iteration_bounds = array<i64: 1, 1>, scalar_prefetch = 0 : i64, scratch_operands = 2 : i64, tpu.core_type = #tpu.core_type<tc>, window_params = [{transform_indices = @transform_0, window_bounds = array<i64: 16, 32>}, {pipeline_mode = #tpu.pipeline_mode<synchronous>, transform_indices = @transform_1, window_bounds = array<i64: 1, 32>}, {pipeline_mode = #tpu.pipeline_mode<synchronous>, transform_indices = @transform_2, window_bounds = array<i64: 1, 1>}, {transform_indices = @transform_3, window_bounds = array<i64: 32, 64>}, {transform_indices = @transform_4, window_bounds = array<i64: 16, 64>}]} {
    %c0_i32 = arith.constant 0 : i32
    %0 = arith.cmpi eq, %arg1, %c0_i32 : i32
    %1 = arith.extui %0 : i1 to i32
    %c0_i32_0 = arith.constant 0 : i32
    %2 = arith.cmpi ne, %1, %c0_i32_0 : i32
    scf.if %2 {
      %c0_8 = arith.constant 0 : index
      %c0_9 = arith.constant 0 : index
      %10 = vector.load %arg2[%c0_8, %c0_9] : memref<16x32xf32, #tpu.memory_space<vmem>>, vector<16x32xf32>
      %cst_10 = arith.constant dense<0.000000e+00> : vector<16xf32>
      %11 = vector.multi_reduction <add>, %10, %cst_10 [1] : vector<16x32xf32> to vector<16xf32>
      %12 = vector.shape_cast %11 : vector<16xf32> to vector<16x1xf32>
      %cst_11 = arith.constant 3.200000e+01 : f32
      %13 = vector.broadcast %cst_11 : f32 to vector<16x1xf32>
      %14 = arith.divf %12, %13 : vector<16x1xf32>
      %15 = vector.broadcast %14 : vector<16x1xf32> to vector<16x32xf32>
      %16 = arith.subf %10, %15 : vector<16x32xf32>
      %17 = arith.mulf %16, %16 : vector<16x32xf32>
      %cst_12 = arith.constant dense<0.000000e+00> : vector<16xf32>
      %18 = vector.multi_reduction <add>, %17, %cst_12 [1] : vector<16x32xf32> to vector<16xf32>
      %19 = vector.shape_cast %18 : vector<16xf32> to vector<16x1xf32>
      %cst_13 = arith.constant 3.200000e+01 : f32
      %20 = vector.broadcast %cst_13 : f32 to vector<16x1xf32>
      %21 = arith.divf %19, %20 : vector<16x1xf32>
      %cst_14 = arith.constant 9.99999974E-6 : f32
      %22 = vector.broadcast %cst_14 : f32 to vector<16x1xf32>
      %23 = arith.addf %21, %22 : vector<16x1xf32>
      %24 = math.rsqrt %23 : vector<16x1xf32>
      %25 = vector.broadcast %24 : vector<16x1xf32> to vector<16x32xf32>
      %26 = arith.mulf %16, %25 : vector<16x32xf32>
      %c0_15 = arith.constant 0 : index
      %c0_16 = arith.constant 0 : index
      %27 = vector.load %arg3[%c0_15, %c0_16] : memref<1x32xf32, #tpu.memory_space<vmem>>, vector<1x32xf32>
      %28 = vector.broadcast %27 : vector<1x32xf32> to vector<16x32xf32>
      %29 = arith.mulf %26, %28 : vector<16x32xf32>
      %30 = math.absf %29 : vector<16x32xf32>
      %cst_17 = arith.constant dense<0xFF800000> : vector<16xf32>
      %31 = vector.multi_reduction <maximumf>, %30, %cst_17 [1] : vector<16x32xf32> to vector<16xf32>
      %32 = vector.shape_cast %31 : vector<16xf32> to vector<16x1xf32>
      %cst_18 = arith.constant 9.99999974E-6 : f32
      %33 = vector.broadcast %cst_18 : f32 to vector<16x1xf32>
      %34 = arith.maximumf %32, %33 : vector<16x1xf32>
      %cst_19 = arith.constant 1.270000e+02 : f32
      %35 = vector.broadcast %cst_19 : f32 to vector<16x1xf32>
      %36 = arith.divf %35, %34 : vector<16x1xf32>
      %37 = vector.broadcast %36 : vector<16x1xf32> to vector<16x32xf32>
      %38 = arith.mulf %29, %37 : vector<16x32xf32>
      %39 = math.roundeven %38 : vector<16x32xf32>
      %cst_20 = arith.constant -1.280000e+02 : f32
      %cst_21 = arith.constant 1.270000e+02 : f32
      %40 = vector.broadcast %cst_20 : f32 to vector<16x32xf32>
      %41 = arith.maximumf %40, %39 : vector<16x32xf32>
      %42 = vector.broadcast %cst_21 : f32 to vector<16x32xf32>
      %43 = arith.minimumf %42, %41 : vector<16x32xf32>
      %44 = arith.truncf %43 : vector<16x32xf32> to vector<16x32xbf16>
      %c0_22 = arith.constant 0 : index
      %c0_23 = arith.constant 0 : index
      %45 = vector.load %arg7[%c0_22, %c0_23] : memref<16x32xbf16, #tpu.memory_space<vmem>>, vector<16x32xbf16>
      tpu.vector_store %arg7[%c0_22, %c0_23], %44 {strides = array<i32>} : memref<16x32xbf16, #tpu.memory_space<vmem>>, vector<16x32xbf16>,
      %c0_24 = arith.constant 0 : index
      %c0_25 = arith.constant 0 : index
      %46 = vector.load %arg4[%c0_24, %c0_25] : memref<1x1xf32, #tpu.memory_space<vmem>>, vector<1x1xf32>
      %cst_26 = arith.constant 0.00787401571 : f32
      %47 = vector.broadcast %cst_26 : f32 to vector<1x1xf32>
      %48 = arith.mulf %46, %47 : vector<1x1xf32>
      %49 = vector.broadcast %48 : vector<1x1xf32> to vector<16x1xf32>
      %50 = arith.mulf %34, %49 : vector<16x1xf32>
      %c0_27 = arith.constant 0 : index
      %c0_28 = arith.constant 0 : index
      %51 = vector.load %arg8[%c0_27, %c0_28] : memref<16x1xf32, #tpu.memory_space<vmem>>, vector<16x1xf32>
      tpu.vector_store %arg8[%c0_27, %c0_28], %50 {strides = array<i32>} : memref<16x1xf32, #tpu.memory_space<vmem>>, vector<16x1xf32>,
    } else {
    }
    %c0 = arith.constant 0 : index
    %c0_1 = arith.constant 0 : index
    %3 = vector.load %arg7[%c0, %c0_1] : memref<16x32xbf16, #tpu.memory_space<vmem>>, vector<16x32xbf16>
    %c0_2 = arith.constant 0 : index
    %c0_3 = arith.constant 0 : index
    %4 = vector.load %arg5[%c0_2, %c0_3] : memref<32x64xbf16, #tpu.memory_space<vmem>>, vector<32x64xbf16>
    %cst = arith.constant dense<0.000000e+00> : vector<16x64xf32>
    %5 = tpu.matmul %3, %4, %cst {dimension_numbers = #tpu.dot_dimension_numbers<[1], [0], [0], [1], [0, 0, 1, 1], [], []>} : vector<16x32xbf16>, vector<32x64xbf16>, vector<16x64xf32> -> vector<16x64xf32>
    %c0_4 = arith.constant 0 : index
    %c0_5 = arith.constant 0 : index
    %6 = vector.load %arg8[%c0_4, %c0_5] : memref<16x1xf32, #tpu.memory_space<vmem>>, vector<16x1xf32>
    %7 = vector.broadcast %6 : vector<16x1xf32> to vector<16x64xf32>
    %8 = arith.mulf %5, %7 : vector<16x64xf32>
    %c0_6 = arith.constant 0 : index
    %c0_7 = arith.constant 0 : index
    %9 = vector.load %arg6[%c0_6, %c0_7] : memref<16x64xf32, #tpu.memory_space<vmem>>, vector<16x64xf32>
    tpu.vector_store %arg6[%c0_6, %c0_7], %8 {strides = array<i32>} : memref<16x64xf32, #tpu.memory_space<vmem>>, vector<16x64xf32>,
    return
  }
  func.func @transform_0(%arg0: i32, %arg1: i32) -> (i32, i32) {
    %c0_i32 = arith.constant 0 : i32
    %c0_i32_0 = arith.constant 0 : i32
    return %arg0, %c0_i32 : i32, i32
  }
  func.func @transform_1(%arg0: i32, %arg1: i32) -> (i32, i32) {
    %c0_i32 = arith.constant 0 : i32
    %c0_i32_0 = arith.constant 0 : i32
    %c0_i32_1 = arith.constant 0 : i32
    return %c0_i32, %c0_i32_0 : i32, i32
  }
  func.func @transform_2(%arg0: i32, %arg1: i32) -> (i32, i32) {
    %c0_i32 = arith.constant 0 : i32
    %c0_i32_0 = arith.constant 0 : i32
    %c0_i32_1 = arith.constant 0 : i32
    return %c0_i32, %c0_i32_0 : i32, i32
  }
  func.func @transform_3(%arg0: i32, %arg1: i32) -> (i32, i32) {
    %c0_i32 = arith.constant 0 : i32
    %c0_i32_0 = arith.constant 0 : i32
    return %c0_i32, %arg1 : i32, i32
  }
  func.func @transform_4(%arg0: i32, %arg1: i32) -> (i32, i32) {
    %c0_i32 = arith.constant 0 : i32
    return %arg0, %arg1 : i32, i32
  }
}

</mosaic_0001>

<bundles_post_ra>
// kernel: tpu_custom_call.1
= control target key start
LH: loop header
LB: loop body
LE: loop exit
PB: predicated region body
PF: predicated region fallthrough
CT: control target
= control target key end

     0   :  { %s429_s0 = inlined_call_operand.hbm [shape: f32[16,32], index: 0, kind: input, shape index: {}]   ;;  %s430_s1 = inlined_call_operand.vmem [shape: f32[1,32], index: 1, kind: input, shape index: {}]   ;;  %s431_s2 = inlined_call_operand.<no memory space> [shape: f32[1,1], index: 2, kind: input, shape index: {}]   ;;  %s432_s3 = inlined_call_operand.hbm [shape: bf16[32,64], index: 3, kind: input, shape index: {}]   ;;  %s433_s4 = inlined_call_operand.hbm [shape: f32[16,64], index: 4, kind: output, shape index: {}]  }
   0x1   :  { %v9_v0 = vstv %s431_s2 }
   0x2   :  { %10 = vst [vmem:[#allocation4] sm:$0x1] %v9_v0 }
   0x3   :  { %11 = vsyncpa [#allocation6], 0 }
   0x4   :  { %12 = vsyncpa [#allocation9], 0 }
   0x5   :  { %13 = vsyncpa [#allocation7], 0  ;;  %s366_s17 = smov [#allocation5]  }
   0x6   :  { %s19_s18 = sshll.u32 %s366_s17, 4  ;;  %s20_s18 = int_to_ptr.vmem [resolvable:$true] %s19_s18 }
   0x7   :  { %s308_s19 = scalar_lea.vmem %s20_s18, 256  ;;  %p313_p1 = scmp.lt.s32.totalorder %s20_s18, %s20_s18 }
   0x8   :  { %p309_p0 = scmp.ne.s32.totalorder %s20_s18, %s308_s19  ;;  %p314_p2 = scmp.lt.s32.totalorder %s308_s19, %s308_s19 }
   0xa   :  { %p315_p3 = por %p314_p2, %p313_p1 }
   0xc   :  { %p316_p4 = pnand %p315_p3, %p309_p0 }
   0xe   :  { %319 = shalt.err (!%p316_p4)
}
   0xf   :  { %s367_s20 = smov 128   ;;  %s368_s21 = smov 8  }
  0x10   :  { %25 = dma.hbm_to_vmem [thread:$0]  %s429_s0, 256, %s20_s18, [#allocation6], %s367_s20, %s367_s20, %s368_s21  }
  0x11   :  { %s369_s23 = smov [#allocation8]  }
  0x12   :  { %s35_s24 = sshll.u32 %s369_s23, 4  ;;  %s36_s24 = int_to_ptr.vmem [resolvable:$true] %s35_s24 }
  0x13   :  { %s328_s25 = scalar_lea.vmem %s36_s24, 256  ;;  %p333_p6 = scmp.lt.s32.totalorder %s36_s24, %s36_s24 }
  0x14   :  { %p329_p5 = scmp.ne.s32.totalorder %s36_s24, %s328_s25  ;;  %p334_p7 = scmp.lt.s32.totalorder %s328_s25, %s328_s25 }
  0x16   :  { %p335_p8 = por %p334_p7, %p333_p6 }
  0x18   :  { %p336_p9 = pnand %p335_p8, %p329_p5 }
  0x1a   :  { %339 = shalt.err (!%p336_p9)
}
  0x1b   :  { %s370_s26 = smov 64   ;;  %s371_s27 = smov 4  }
  0x1c   :  { %41 = dma.hbm_to_vmem [thread:$0]  %s432_s3, 256, %s36_s24, [#allocation9], %s370_s26, %s370_s26, %s371_s27  }
  0x1d   :  { %360 = dma.done.wait [#allocation6], 256  }
  0x1e   :  { %361 = vsyncadd [#allocation6], 4294967040 }
  0x1f   :  { %362 = dma.done.wait [#allocation9], 256  }
  0x20   :  { %363 = vsyncadd [#allocation9], 4294967040  ;;  %vm55_vm0 = vcmask 261120   ;;  %v53_v1 = vld [vmem:[#allocation5] sm:$0xff]  ;;  %v54_v2 = vld [vmem:[#allocation5 + $0x8] sm:$0xff]  ;;  %v372_v32 = vmov 0   ;;  %v128_v36 = vlaneseq }
  0x21   :  { %v56_v3 = vsel %vm55_vm0, %v53_v1, 0.0  ;;  %v59_v4 = vsel %vm55_vm0, %v54_v2, 0.0  ;;  %v241_v22 = vld [vmem:[%s430_s1] ss:$0 sm:$0xff]  ;;  %287 = vset.pattern.permute.xlu0 %v372_v32  ;;  %288 = vset.pattern.permute.xlu1 %v372_v32  ;;  %v289_v33 = vld [vmem:[#allocation8 + $0x8] sm:$0xff]   ;;  %v373_v34 = vmov 0.0  }
  0x22   :  { %57 = vadd.xlane.f32.xlu0 %v56_v3  ;;  %253 = vmatprep.subr.bf16.mxu0 %v373_v34  ;;  %vm374_vm1 = vmmov 0   ;;  %v290_v35 = vld [vmem:[#allocation8] sm:$0xff]   ;;  %v129_v37 = vshrl.u32 %v128_v36, 7  ;;  %v125_v38 = vld [vmem:[#allocation4] sm:$0x1]  ;;  %vm135_vm2 = vcmask 7168  }
  0x23   :  { %257 = vmatprep.mubr.msk.bf16.mxu0 %vm374_vm1, %v373_v34  ;;  %254 = vmatpush3.bf16.msra.mxu0 %v289_v33  ;;  %v126_v39 = vmul.f32 0.007874016, %v125_v38  ;;  %vm122_vm5 = vcmask 257024   ;;  %vm220_vm6 = vcmask 523264   ;;  %s375_s1 = smov [#allocation10]  }
  0x24   :  { %255 = vmatprep.subr.bf16.mxu0 %v373_v34  ;;  %v130_v40 = vsub.s32 0, %v129_v37  ;;  %s228_s30 = sshll.u32 %s375_s1, 4  ;;  %s229_s30 = int_to_ptr.vmem [resolvable:$true] %s228_s30 }
  0x25   :  { %s340_s5 = scalar_lea.vmem %s229_s30, 256  ;;  %p345_p11 = scmp.lt.s32.totalorder %s229_s30, %s229_s30 }
  0x26   :  { %60 = vadd.xlane.f32.xlu0 %v59_v4  ;;  %v131_v41 = vrot.slane %v126_v39, %v130_v40  ;;  %p341_p10 = scmp.ne.s32.totalorder %s229_s30, %s340_s5  ;;  %p346_p12 = scmp.lt.s32.totalorder %s340_s5, %s340_s5 }
  0x27   :  { %256 = vmatpush3.bf16.msra.mxu0 %v290_v35 }
  0x28   :  { %p347_p13 = por %p346_p12, %p345_p11 }
  0x2a   :  { %p348_p0 = pnand %p347_p13, %p341_p10 }
  0xab   :  { %v58_v5 = vpop.xlane.xlu0 %57 }
  0xac   :  { %v63_v6 = vmul.f32 0.03125, %v58_v5 }
  0xae   :  { %v65_v7 = vsub.f32 %v53_v1, %v63_v6 }
  0xaf   :  { %v61_v8 = vpop.xlane.xlu0 %60 }
  0xb0   :  { %v64_v9 = vmul.f32 0.03125, %v61_v8  ;;  %v67_v10 = vmul.f32 %v65_v7, %v65_v7 }
  0xb2   :  { %v66_v11 = vsub.f32 %v54_v2, %v64_v9  ;;  %v69_v12 = vsel %vm55_vm0, %v67_v10, 0.0 }
  0xb3   :  { %70 = vadd.xlane.f32.xlu1 %v69_v12 }
  0xb4   :  { %v68_v13 = vmul.f32 %v66_v11, %v66_v11 }
  0xb6   :  { %v72_v14 = vsel %vm55_vm0, %v68_v13, 0.0 }
  0xb7   :  { %73 = vadd.xlane.f32.xlu1 %v72_v14 }
 0x13c   :  { %v71_v15 = vpop.xlane.xlu1 %70 }
 0x13d   :  { %v75_v16 = vmul.f32 0.03125, %v71_v15 }
 0x13f   :  { %v77_v17 = vadd.f32 1e-05, %v75_v16 }
 0x140   :  { %v74_v18 = vpop.xlane.xlu1 %73 }
 0x141   :  { %292 = vrsqrt.f32 %v77_v17  ;;  %v76_v19 = vmul.f32 0.03125, %v74_v18 }
 0x143   :  { %v78_v20 = vadd.f32 1e-05, %v76_v19 }
 0x145   :  { %294 = vrsqrt.f32 %v78_v20 }
 0x14e   :  { %v293_v21 = vpop.eup %292 }
 0x14f   :  { %v81_v23 = vmul.f32 %v293_v21, %v65_v7 }
 0x151   :  { %v90_v24 = vmul.f32 %v241_v22, %v81_v23 }
 0x152   :  { %v295_v25 = vpop.eup %294 }
 0x153   :  { %v92_v26 = vand.u32 2147483647, %v90_v24  ;;  %v82_v27 = vmul.f32 %v295_v25, %v66_v11 }
 0x155   :  { %v94_v28 = vsel %vm55_vm0, %v92_v26, -inf  ;;  %v91_v29 = vmul.f32 %v241_v22, %v82_v27 }
 0x156   :  { %95 = vmax.xlane.f32.xlu0 %v94_v28 }
 0x157   :  { %v93_v30 = vand.u32 2147483647, %v91_v29 }
 0x159   :  { %v97_v31 = vsel %vm55_vm0, %v93_v30, -inf }
 0x15a   :  { %98 = vmax.xlane.f32.xlu1 %v97_v31 }
 0x1df   :  { %v96_v42 = vpop.xlane.xlu0 %95 }
 0x1e0   :  { %v100_v43 = vmax.f32 %v96_v42, 1e-05 }
 0x1e2   :  { %296 = vrcp.f32 %v100_v43  ;;  %v133_v44 = vmul.f32 %v131_v41, %v100_v43 }
 0x1e3   :  { %v99_v45 = vpop.xlane.xlu1 %98 }
 0x1e4   :  { %136 = vst.msk [vmem:[#allocation3] sm:$0xff] %vm135_vm2, %v133_v44  ;;  %v101_v46 = vmax.f32 %v99_v45, 1e-05 }
 0x1e6   :  { %298 = vrcp.f32 %v101_v46  ;;  %v134_v47 = vmul.f32 %v131_v41, %v101_v46 }
 0x1e8   :  { %137 = vst.msk [vmem:[#allocation3 + $0x8] sm:$0xff] %vm135_vm2, %v134_v47 }
 0x1eb   :  { %v206_v48 = vld [vmem:[#allocation3] sm:$0xff] }
 0x1ec   :  { %210 = vperm.xlu0 %287, %v206_v48  }
 0x1ef   :  { %v297_v49 = vpop.eup %296  ;;  %v207_v50 = vld [vmem:[#allocation3 + $0x8] sm:$0xff] }
 0x1f0   :  { %v103_v51 = vmul.f32 127.0, %v297_v49  ;;  %215 = vperm.xlu1 %288, %v207_v50  }
 0x1f2   :  { %v106_v52 = vmul.f32 %v103_v51, %v90_v24 }
 0x1f3   :  { %v299_v53 = vpop.eup %298 }
 0x1f4   :  { %v263_v54 = vcvt.f32.s32 %v106_v52  ;;  %v105_v55 = vmul.f32 127.0, %v299_v53  ;;  %v261_v58 = vand.u32 2147483647, %v106_v52  ;;  %v266_v60 = vand.u32 2147483648, %v106_v52 }
 0x1f6   :  { %v264_v56 = vcvt.s32.f32 %v263_v54  ;;  %v107_v57 = vmul.f32 %v105_v55, %v91_v29  ;;  %vm262_vm3 = vcmp.lt.f32.partialorder %v261_v58, 8388608.0 }
 0x1f8   :  { %v265_v59 = vand.u32 2147483647, %v264_v56  ;;  %v271_v61 = vcvt.f32.s32 %v107_v57  ;;  %v269_v0 = vand.u32 2147483647, %v107_v57  ;;  %v274_v3 = vand.u32 2147483648, %v107_v57 }
 0x1fa   :  { %v267_v62 = vor.u32 %v266_v60, %v265_v59  ;;  %v272_v63 = vcvt.s32.f32 %v271_v61  ;;  %vm270_vm4 = vcmp.lt.f32.partialorder %v269_v0, 8388608.0 }
 0x1fc   :  { %v268_v1 = vsel %vm262_vm3, %v267_v62, %v106_v52  ;;  %v273_v2 = vand.u32 2147483647, %v272_v63 }
 0x1fd   :  { %v110_v4 = vmax.f32 %v268_v1, -128.0 }
 0x1fe   :  { %v275_v5 = vor.u32 %v274_v3, %v273_v2 }
 0x1ff   :  { %v112_v6 = vmin.f32 %v110_v4, 127.0 }
 0x200   :  { %v276_v7 = vsel %vm270_vm4, %v275_v5, %v107_v57 }
 0x201   :  { %v248_v8 = vpack.c.bf16 %v112_v6, %v112_v6  ;;  %v111_v9 = vmax.f32 %v276_v7, -128.0 }
 0x203   :  { %123 = vst.msk [vmem:[#allocation2] sm:$0xf] %vm122_vm5, %v248_v8  ;;  %v113_v10 = vmin.f32 %v111_v9, 127.0 }
 0x205   :  { %v249_v11 = vpack.c.bf16 %v113_v10, %v113_v10 }
 0x207   :  { %124 = vst.msk [vmem:[#allocation2 + $0x4] sm:$0xf] %vm122_vm5, %v249_v11 }
 0x20e   :  { %v291_v12 = vld [vmem:[#allocation2] sm:$0xff]  }
 0x20f   :  { %258 = vmatmul.mubr.msk.bf16.vlgmr.msra.gmra.mxu0 %vm55_vm0, %v291_v12 }
 0x267   :  { %v211_v13 = vpop.permute.xlu0 %210 }
 0x26b   :  { %v216_v17 = vpop.permute.xlu1 %215 }
 0x2cf   :  { %v199_v14 = vpop.f32.mrf.mxu0 }
 0x2d0   :  { %v218_v15 = vmul.f32 %v211_v13, %v199_v14 }
 0x2d1   :  { %v259_v16 = vpop.f32.mrf.mxu0 }
 0x2d2   :  { %221 = vst.msk [vmem:[#allocation10] sm:$0xff] %vm220_vm6, %v218_v15 }
 0x2d3   :  { %v202_v18 = vpop.f32.mrf.mxu0 }
 0x2d4   :  { %v219_v19 = vmul.f32 %v216_v17, %v202_v18 }
 0x2d5   :  { %v260_v20 = vpop.f32.mrf.mxu0 }
 0x2d6   :  { %222 = vst.msk [vmem:[#allocation10 + $0x8] sm:$0xff] %vm220_vm6, %v219_v19 }
 0x2d7   :  { %351 = shalt.err (!%p348_p0)
}
 0x2d8   :  { %234 = dma.vmem_to_hbm [thread:$0]  %s229_s30, 256, %s433_s4, [#allocation7], %s367_s20, %s367_s20, %s368_s21  }
 0x2d9   :  { %364 = dma.done.wait [#allocation7], 256  }
 0x2da   :  { %365 = vsyncadd [#allocation7], 4294967040 }
 0x2db   :  { %238 = vsyncpa [#allocation6], 1 }
 0x2dc   :  { %239 = vsyncpa [#allocation9], 1 }
 0x2dd   :  { %240 = vsyncpa [#allocation7], 1 }

</bundles_post_ra>
